<compile_context>
chip_gen: v7x
topology: tpu7x:2x2x1
jax: 0.10.0
libtpu: 0.0.40
codegen_flags: <defaults>
</compile_context>

<pallas_src>
import jax
import jax.numpy as jnp
from jax import lax
from jax.experimental import pallas as pl
from jax.experimental.pallas import tpu as pltpu


def _round_up(x, m):
    return (x + m - 1) // m * m


def _lane(n):
    return _round_up(max(int(n), 1), 128)


def _sub(n):
    return _round_up(max(int(n), 1), 8)


def _slab_offsets(E, Wa, Wk):
    """128-lane-aligned offsets for [u | v | beta_ans | beta_key] in the slab."""
    off_u = 0
    off_v = off_u + _lane(E)
    off_ba = off_v + _lane(E)
    off_bk = off_ba + _lane(Wa)
    pack = off_bk + _lane(Wk)
    return off_u, off_v, off_ba, off_bk, pack


def _per_sample_vmem_bytes(Wa, Wk, E, pack):
    """Rough per-sample VMEM footprint (lane/sublane padded, f32)."""
    f32 = 4
    io = (_sub(Wa) * _lane(E)            # ans tile
          + _sub(Wk) * _lane(E)          # key tile
          + _lane(Wa) + _lane(Wk)        # masks
          + 3 * _sub(Wk) * _lane(Wa)     # Z / Zsa / Zsk outputs
          + pack) * f32                  # small slab
    interm = (10 * _sub(Wk) * _lane(Wa)  # Z, Z_cos, ea/ek, Zsa, Zsk, ... (padded)
              + 2 * _sub(Wa) * _lane(E)
              + 2 * _sub(Wk) * _lane(E)) * f32
    return 2 * io + interm               # double-buffered IO + live intermediates


def _choose_block_batch(B, cap, prefer_steps=2):
    """Pick the batch block TB.

    - TB == B (one step) or a multiple-of-8 divisor of B, so the 2-D
      (batch, words) BlockSpecs stay tiling-legal and no wrapper pad is needed.
    - If B is comfortably large, split into >= `prefer_steps` steps so v7x's
      two TensorCores both get work via the parallel grid axis.
    """
    cap = max(1, int(cap))
    if B <= cap:
        half = B // prefer_steps
        if prefer_steps >= 2 and half >= 8 and half % 8 == 0 and B % half == 0:
            return half
        return B
    t = (cap // 8) * 8
    while t >= 8:
        if B % t == 0:
            return t
        t -= 8
    return max(8, (cap // 8) * 8)   # no aligned divisor: caller pads the batch


def key_attention_kernel(ans_ref, mask_ans_ref, key_ref, mask_key_ref,
                         zpack_ref, slab_ref):
    TB, Wa, E = ans_ref.shape
    Wk = key_ref.shape[1]
    off_u, off_v, off_ba, off_bk, _ = _slab_offsets(E, Wa, Wk)
    hp = lax.Precision.HIGHEST

    ans = ans_ref[...]              # (TB, Wa, E)
    key = key_ref[...]              # (TB, Wk, E)
    mask_ans = mask_ans_ref[...]    # (TB, Wa)
    mask_key = mask_key_ref[...]    # (TB, Wk)

    # Additive "-inf" masks. For {0,1} masks, (m-1)*10000 == |m-1| * -10000.
    # Broadcast once and reuse (JAX does not CSE broadcast_in_dim).
    mask_ans_inf = ((mask_ans - 1.0) * 10000.0)[:, None, :]   # (TB, 1, Wa)
    mask_key_inf = ((mask_key - 1.0) * 10000.0)[:, :, None]   # (TB, Wk, 1)
    mask_ans_col = mask_ans[:, :, None]                       # (TB, Wa, 1)
    mask_key_col = mask_key[:, :, None]                       # (TB, Wk, 1)

    # Zero out padded tokens.
    ans_m = ans * mask_ans_col                                # (TB, Wa, E)
    key_m = key * mask_key_col                                # (TB, Wk, E)

    # Z = key @ ans^T per batch element (contraction over E on the MXU,
    # no explicit transposes). precision=HIGHEST -> true f32 result.
    Z = jnp.einsum('bke,bae->bka', key_m, ans_m,
                   precision=hp, preferred_element_type=jnp.float32)

    # Cosine-normalised scores (feed the beta_* gates when op='dp'); rsqrt on EUP.
    rs_ans = lax.rsqrt(jnp.maximum(jnp.sum(ans_m * ans_m, -1), 1e-7))  # (TB, Wa)
    rs_key = lax.rsqrt(jnp.maximum(jnp.sum(key_m * key_m, -1), 1e-7))  # (TB, Wk)
    Z_cos = Z * rs_key[:, :, None] * rs_ans[:, None, :]                # (TB, Wk, Wa)

    # Masked softmax over the ans axis (last dim). Exact division.
    sa = Z + mask_ans_inf
    ea = jnp.exp(sa - jnp.max(sa, axis=-1, keepdims=True))
    Zsa = ea / jnp.sum(ea, axis=-1, keepdims=True)

    # Masked softmax over the key axis (axis=1), computed directly in the
    # (b, k, a) layout so Z_softmax_key needs no transpose on output.
    sk = Z + mask_key_inf
    ek = jnp.exp(sk - jnp.max(sk, axis=1, keepdims=True))
    Zsk = ek / jnp.sum(ek, axis=1, keepdims=True)

    # Attended features.
    U = jnp.einsum('bka,bae->bke', Zsa, ans_m,
                   precision=hp, preferred_element_type=jnp.float32) * mask_key_col
    V = jnp.einsum('bka,bke->bae', Zsk, key_m,
                   precision=hp, preferred_element_type=jnp.float32) * mask_ans_col

    # beta gates (computed & returned by the torch module even when beta=False).
    beta_key = jax.nn.sigmoid(jnp.max(Z_cos + mask_ans_inf, axis=2) * 5.0)  # (TB, Wk)
    beta_ans = jax.nn.sigmoid(jnp.max(Z_cos + mask_key_inf, axis=1) * 5.0)  # (TB, Wa)

    # word_att_pool='max' (values of torch.max over the word axis).
    u = jnp.max(U, axis=1)   # (TB, E)
    v = jnp.max(V, axis=1)   # (TB, E)

    # ---- packed writes (2 output streams) ----
    zpack_ref[0] = Z
    zpack_ref[1] = Zsa
    zpack_ref[2] = Zsk

    # merge_ans_key='concat': u/v/betas stored at 128-lane-aligned offsets
    # (clean masked stores, no lane rotates); zero-fill once for determinism.
    slab_ref[...] = jnp.zeros(slab_ref.shape, slab_ref.dtype)
    slab_ref[:, off_u:off_u + E] = u
    slab_ref[:, off_v:off_v + E] = v
    slab_ref[:, off_ba:off_ba + Wa] = beta_ans
    slab_ref[:, off_bk:off_bk + Wk] = beta_key


def key_attention_forward(ans, mask_ans, key, mask_key, *,
                          block_batch=128, vmem_budget_bytes=12 << 20):
    """Pallas-backed forward of KeyAttention (dp / max / concat / beta=False)."""
    B, Wa, E = ans.shape
    Wk = key.shape[1]
    off_u, off_v, off_ba, off_bk, PACK = _slab_offsets(E, Wa, Wk)

    # f32 compute for parity with the torch f32 reference.
    ans = ans.astype(jnp.float32)
    key = key.astype(jnp.float32)
    mask_ans = mask_ans.astype(jnp.float32)
    mask_key = mask_key.astype(jnp.float32)

    # Batch block: as large as a conservative VMEM budget allows (safe within
    # every generation's scoped-VMEM default, incl. v7x's smaller VMEM), but
    # split into >=2 grid steps when B is big enough (v7x has 2 TensorCores).
    per_sample = _per_sample_vmem_bytes(Wa, Wk, E, PACK)
    cap = min(int(block_batch), max(1, vmem_budget_bytes // per_sample))
    TB = _choose_block_batch(B, cap)

    B_pad = _round_up(B, TB)
    if B_pad != B:
        # TODO(synk): a tail-sized second pallas_call would avoid this extra
        # HBM copy of the inputs; only reached when B has no aligned divisor.
        pb = B_pad - B
        ans = jnp.pad(ans, ((0, pb), (0, 0), (0, 0)))
        key = jnp.pad(key, ((0, pb), (0, 0), (0, 0)))
        mask_ans = jnp.pad(mask_ans, ((0, pb), (0, 0)))
        mask_key = jnp.pad(mask_key, ((0, pb), (0, 0)))

    grid = (B_pad // TB,)

    out_shapes = (
        jax.ShapeDtypeStruct((3, B_pad, Wk, Wa), jnp.float32),  # Z / Zsa / Zsk
        jax.ShapeDtypeStruct((B_pad, PACK), jnp.float32),       # u|v|beta_ans|beta_key
    )

    zpack, slab = pl.pallas_call(
        key_attention_kernel,
        out_shape=out_shapes,
        grid=grid,
        in_specs=[
            pl.BlockSpec((TB, Wa, E), lambda b: (b, 0, 0)),
            pl.BlockSpec((TB, Wa), lambda b: (b, 0)),
            pl.BlockSpec((TB, Wk, E), lambda b: (b, 0, 0)),
            pl.BlockSpec((TB, Wk), lambda b: (b, 0)),
        ],
        out_specs=(
            pl.BlockSpec((3, TB, Wk, Wa), lambda b: (0, b, 0, 0)),
            pl.BlockSpec((TB, PACK), lambda b: (b, 0)),
        ),
        compiler_params=pltpu.CompilerParams(
            dimension_semantics=("parallel",)),
    )(ans, mask_ans, key, mask_key)

    Z = zpack[0, :B]
    Zsa = zpack[1, :B]
    Zsk = zpack[2, :B]
    u = slab[:B, off_u:off_u + E]
    v = slab[:B, off_v:off_v + E]
    f = jnp.concatenate([u, v], axis=1)
    beta_ans = slab[:B, off_ba:off_ba + Wa].reshape(B, 1, Wa)
    beta_key = slab[:B, off_bk:off_bk + Wk].reshape(B, 1, Wk)
    return [f, Z, Zsa, Zsk, beta_ans, beta_key]


def key_attention_reference(ans, mask_ans, key, mask_key):
    """Pure-JAX mirror of the torch forward (for correctness checking)."""
    hp = lax.Precision.HIGHEST
    mask_ans_inf = jnp.abs(mask_ans - 1.0) * -10000.0
    mask_key_inf = jnp.abs(mask_key - 1.0) * -10000.0
    ans_m = ans * mask_ans[:, :, None]
    key_m = key * mask_key[:, :, None]
    Z = jnp.einsum('bke,bae->bka', key_m, ans_m, precision=hp)
    norm_ans = jnp.sqrt(jnp.maximum(jnp.sum(ans_m ** 2, -1), 1e-7))
    norm_key = jnp.sqrt(jnp.maximum(jnp.sum(key_m ** 2, -1), 1e-7))
    Z_cos = Z / (norm_key[:, :, None] * norm_ans[:, None, :])
    Zsk = jax.nn.softmax(Z + mask_key_inf[:, :, None], axis=1)
    V = jnp.einsum('bka,bke->bae', Zsk, key_m, precision=hp) * mask_ans[:, :, None]
    Zsa = jax.nn.softmax(Z + mask_ans_inf[:, None, :], axis=-1)
    U = jnp.einsum('bka,bae->bke', Zsa, ans_m, precision=hp) * mask_key[:, :, None]
    beta_key = jax.nn.sigmoid(jnp.max(Z_cos + mask_ans_inf[:, None, :], axis=2) * 5.0)
    beta_ans = jax.nn.sigmoid(jnp.max(Z_cos + mask_key_inf[:, :, None], axis=1) * 5.0)
    u = jnp.max(U, axis=1)
    v = jnp.max(V, axis=1)
    f = jnp.concatenate([u, v], axis=1)
    return [f, Z, Zsa, Zsk, beta_ans[:, None, :], beta_key[:, None, :]]


if __name__ == "__main__":
    # Small shapes consistent with the module:
    #   batch_size=2, num_words (ans)=8, max_keyword_len (key)=8, emb_dim=32
    B, Wa, Wk, E = 2, 8, 8, 32

    k0 = jax.random.PRNGKey(0)
    k_ans, k_key = jax.random.split(k0)
    ans = jax.random.normal(k_ans, (B, Wa, E), dtype=jnp.float32)
    key = jax.random.normal(k_key, (B, Wk, E), dtype=jnp.float32)

    # Deterministic {0,1} float masks (variable valid lengths per batch element)
    ans_lens = jnp.array([6, 8], dtype=jnp.int32)
    key_lens = jnp.array([5, 7], dtype=jnp.int32)
    mask_ans = (jnp.arange(Wa)[None, :] < ans_lens[:, None]).astype(jnp.float32)
    mask_key = (jnp.arange(Wk)[None, :] < key_lens[:, None]).astype(jnp.float32)

    outs = key_attention_forward(ans, mask_ans, key, mask_key)
    outs = jax.block_until_ready(outs)
    refs = key_attention_reference(ans, mask_ans, key, mask_key)

    f, Z, Zsa, Zsk, beta_ans, beta_key = outs
    assert f.shape == (B, 2 * E)
    assert Z.shape == (B, Wk, Wa)
    assert Zsa.shape == (B, Wk, Wa)
    assert Zsk.shape == (B, Wk, Wa)
    assert beta_ans.shape == (B, 1, Wa)
    assert beta_key.shape == (B, 1, Wk)

    names = ["f", "Z", "Z_softmax_ans", "Z_softmax_key", "beta_ans", "beta_key"]
    for name, o, r in zip(names, outs, refs):
        assert o.shape == r.shape, (name, o.shape, r.shape)
        assert bool(jnp.all(jnp.isfinite(o))), name
        # Tight tolerance: exact softmax division + precision=HIGHEST matmuls.
        assert bool(jnp.allclose(o, r, rtol=1e-4, atol=1e-4)), (
            name, float(jnp.max(jnp.abs(o - r))))

    print("KERNEL_OK")
</pallas_src>

<mosaic_0001>
module attributes {stable_mosaic.version = 11 : i64} {
  func.func @key_attention_kernel(%arg0: i32, %arg1: memref<2x8x32xf32, #tpu.memory_space<vmem>>, %arg2: memref<2x8xf32, #tpu.memory_space<vmem>>, %arg3: memref<2x8x32xf32, #tpu.memory_space<vmem>>, %arg4: memref<2x8xf32, #tpu.memory_space<vmem>>, %arg5: memref<3x2x8x8xf32, #tpu.memory_space<vmem>>, %arg6: memref<2x512xf32, #tpu.memory_space<vmem>>) attributes {dimension_semantics = [#tpu.dimension_semantics<parallel>], iteration_bounds = array<i64: 1>, scalar_prefetch = 0 : i64, scratch_operands = 0 : i64, tpu.core_type = #tpu.core_type<tc>, window_params = [{transform_indices = @transform_0, window_bounds = array<i64: 2, 8, 32>}, {transform_indices = @transform_1, window_bounds = array<i64: 2, 8>}, {transform_indices = @transform_2, window_bounds = array<i64: 2, 8, 32>}, {transform_indices = @transform_3, window_bounds = array<i64: 2, 8>}, {transform_indices = @transform_4, window_bounds = array<i64: 3, 2, 8, 8>}, {transform_indices = @transform_5, window_bounds = array<i64: 2, 512>}]} {
    %c0 = arith.constant 0 : index
    %c0_0 = arith.constant 0 : index
    %c0_1 = arith.constant 0 : index
    %0 = vector.load %arg1[%c0, %c0_0, %c0_1] : memref<2x8x32xf32, #tpu.memory_space<vmem>>, vector<2x8x32xf32>
    %c0_2 = arith.constant 0 : index
    %c0_3 = arith.constant 0 : index
    %c0_4 = arith.constant 0 : index
    %1 = vector.load %arg3[%c0_2, %c0_3, %c0_4] : memref<2x8x32xf32, #tpu.memory_space<vmem>>, vector<2x8x32xf32>
    %c0_5 = arith.constant 0 : index
    %c0_6 = arith.constant 0 : index
    %2 = vector.load %arg2[%c0_5, %c0_6] : memref<2x8xf32, #tpu.memory_space<vmem>>, vector<2x8xf32>
    %c0_7 = arith.constant 0 : index
    %c0_8 = arith.constant 0 : index
    %3 = vector.load %arg4[%c0_7, %c0_8] : memref<2x8xf32, #tpu.memory_space<vmem>>, vector<2x8xf32>
    %cst = arith.constant 1.000000e+00 : f32
    %4 = vector.broadcast %cst : f32 to vector<2x8xf32>
    %5 = arith.subf %2, %4 : vector<2x8xf32>
    %cst_9 = arith.constant 1.000000e+04 : f32
    %6 = vector.broadcast %cst_9 : f32 to vector<2x8xf32>
    %7 = arith.mulf %5, %6 : vector<2x8xf32>
    %8 = vector.shape_cast %7 : vector<2x8xf32> to vector<2x1x8xf32>
    %cst_10 = arith.constant 1.000000e+00 : f32
    %9 = vector.broadcast %cst_10 : f32 to vector<2x8xf32>
    %10 = arith.subf %3, %9 : vector<2x8xf32>
    %cst_11 = arith.constant 1.000000e+04 : f32
    %11 = vector.broadcast %cst_11 : f32 to vector<2x8xf32>
    %12 = arith.mulf %10, %11 : vector<2x8xf32>
    %13 = vector.shape_cast %12 : vector<2x8xf32> to vector<2x8x1xf32>
    %14 = vector.shape_cast %2 : vector<2x8xf32> to vector<2x8x1xf32>
    %15 = vector.shape_cast %3 : vector<2x8xf32> to vector<2x8x1xf32>
    %16 = vector.broadcast %14 : vector<2x8x1xf32> to vector<2x8x32xf32>
    %17 = arith.mulf %0, %16 : vector<2x8x32xf32>
    %18 = vector.broadcast %15 : vector<2x8x1xf32> to vector<2x8x32xf32>
    %19 = arith.mulf %1, %18 : vector<2x8x32xf32>
    "tpu.trace_start"() <{level = 10 : i32, message = "bke,bae->bka"}> : () -> ()
    %cst_12 = arith.constant dense<0.000000e+00> : vector<2x8x8xf32>
    %20 = tpu.matmul %19, %17, %cst_12 {dimension_numbers = #tpu.dot_dimension_numbers<[2], [2], [1], [1], [0, 0, 0, 1, 1, 1], [0], [0]>, precision = #tpu.contract_precision<fp32>} : vector<2x8x32xf32>, vector<2x8x32xf32>, vector<2x8x8xf32> -> vector<2x8x8xf32>
    "tpu.trace_stop"() : () -> ()
    %21 = arith.mulf %17, %17 : vector<2x8x32xf32>
    %cst_13 = arith.constant dense<0.000000e+00> : vector<2x8xf32>
    %22 = vector.multi_reduction <add>, %21, %cst_13 [2] : vector<2x8x32xf32> to vector<2x8xf32>
    %cst_14 = arith.constant 1.000000e-07 : f32
    %23 = vector.broadcast %cst_14 : f32 to vector<2x8xf32>
    %24 = arith.maximumf %22, %23 : vector<2x8xf32>
    %25 = math.rsqrt %24 : vector<2x8xf32>
    %26 = arith.mulf %19, %19 : vector<2x8x32xf32>
    %cst_15 = arith.constant dense<0.000000e+00> : vector<2x8xf32>
    %27 = vector.multi_reduction <add>, %26, %cst_15 [2] : vector<2x8x32xf32> to vector<2x8xf32>
    %cst_16 = arith.constant 1.000000e-07 : f32
    %28 = vector.broadcast %cst_16 : f32 to vector<2x8xf32>
    %29 = arith.maximumf %27, %28 : vector<2x8xf32>
    %30 = math.rsqrt %29 : vector<2x8xf32>
    %31 = vector.shape_cast %30 : vector<2x8xf32> to vector<2x8x1xf32>
    %32 = vector.broadcast %31 : vector<2x8x1xf32> to vector<2x8x8xf32>
    %33 = arith.mulf %20, %32 : vector<2x8x8xf32>
    %34 = vector.shape_cast %25 : vector<2x8xf32> to vector<2x1x8xf32>
    %35 = vector.broadcast %34 : vector<2x1x8xf32> to vector<2x8x8xf32>
    %36 = arith.mulf %33, %35 : vector<2x8x8xf32>
    %37 = vector.broadcast %8 : vector<2x1x8xf32> to vector<2x8x8xf32>
    %38 = arith.addf %20, %37 : vector<2x8x8xf32>
    %cst_17 = arith.constant dense<0xFF800000> : vector<2x8xf32>
    %39 = vector.multi_reduction <maximumf>, %38, %cst_17 [2] : vector<2x8x8xf32> to vector<2x8xf32>
    %40 = vector.shape_cast %39 : vector<2x8xf32> to vector<2x8x1xf32>
    %41 = vector.broadcast %40 : vector<2x8x1xf32> to vector<2x8x8xf32>
    %42 = arith.subf %38, %41 : vector<2x8x8xf32>
    %43 = math.exp %42 : vector<2x8x8xf32>
    %cst_18 = arith.constant dense<0.000000e+00> : vector<2x8xf32>
    %44 = vector.multi_reduction <add>, %43, %cst_18 [2] : vector<2x8x8xf32> to vector<2x8xf32>
    %45 = vector.shape_cast %44 : vector<2x8xf32> to vector<2x8x1xf32>
    %46 = vector.broadcast %45 : vector<2x8x1xf32> to vector<2x8x8xf32>
    %47 = arith.divf %43, %46 : vector<2x8x8xf32>
    %48 = vector.broadcast %13 : vector<2x8x1xf32> to vector<2x8x8xf32>
    %49 = arith.addf %20, %48 : vector<2x8x8xf32>
    %cst_19 = arith.constant dense<0xFF800000> : vector<2x8xf32>
    %50 = vector.multi_reduction <maximumf>, %49, %cst_19 [1] : vector<2x8x8xf32> to vector<2x8xf32>
    %51 = vector.shape_cast %50 : vector<2x8xf32> to vector<2x1x8xf32>
    %52 = vector.broadcast %51 : vector<2x1x8xf32> to vector<2x8x8xf32>
    %53 = arith.subf %49, %52 : vector<2x8x8xf32>
    %54 = math.exp %53 : vector<2x8x8xf32>
    %cst_20 = arith.constant dense<0.000000e+00> : vector<2x8xf32>
    %55 = vector.multi_reduction <add>, %54, %cst_20 [1] : vector<2x8x8xf32> to vector<2x8xf32>
    %56 = vector.shape_cast %55 : vector<2x8xf32> to vector<2x1x8xf32>
    %57 = vector.broadcast %56 : vector<2x1x8xf32> to vector<2x8x8xf32>
    %58 = arith.divf %54, %57 : vector<2x8x8xf32>
    "tpu.trace_start"() <{level = 10 : i32, message = "bka,bae->bke"}> : () -> ()
    %cst_21 = arith.constant dense<0.000000e+00> : vector<2x8x32xf32>
    %59 = tpu.matmul %47, %17, %cst_21 {dimension_numbers = #tpu.dot_dimension_numbers<[2], [1], [1], [2], [0, 0, 0, 1, 1, 2], [0], [0]>, precision = #tpu.contract_precision<fp32>} : vector<2x8x8xf32>, vector<2x8x32xf32>, vector<2x8x32xf32> -> vector<2x8x32xf32>
    "tpu.trace_stop"() : () -> ()
    %60 = vector.broadcast %15 : vector<2x8x1xf32> to vector<2x8x32xf32>
    %61 = arith.mulf %59, %60 : vector<2x8x32xf32>
    "tpu.trace_start"() <{level = 10 : i32, message = "bka,bke->bae"}> : () -> ()
    %cst_22 = arith.constant dense<0.000000e+00> : vector<2x8x32xf32>
    %62 = tpu.matmul %58, %19, %cst_22 {dimension_numbers = #tpu.dot_dimension_numbers<[1], [1], [2], [2], [0, 0, 0, 2, 1, 2], [0], [0]>, precision = #tpu.contract_precision<fp32>} : vector<2x8x8xf32>, vector<2x8x32xf32>, vector<2x8x32xf32> -> vector<2x8x32xf32>
    "tpu.trace_stop"() : () -> ()
    %63 = vector.broadcast %14 : vector<2x8x1xf32> to vector<2x8x32xf32>
    %64 = arith.mulf %62, %63 : vector<2x8x32xf32>
    %65 = vector.broadcast %8 : vector<2x1x8xf32> to vector<2x8x8xf32>
    %66 = arith.addf %36, %65 : vector<2x8x8xf32>
    %cst_23 = arith.constant dense<0xFF800000> : vector<2x8xf32>
    %67 = vector.multi_reduction <maximumf>, %66, %cst_23 [2] : vector<2x8x8xf32> to vector<2x8xf32>
    %cst_24 = arith.constant 5.000000e+00 : f32
    %68 = vector.broadcast %cst_24 : f32 to vector<2x8xf32>
    %69 = arith.mulf %67, %68 : vector<2x8xf32>
    %70 = arith.negf %69 : vector<2x8xf32>
    %71 = math.exp %70 : vector<2x8xf32>
    %cst_25 = arith.constant 1.000000e+00 : f32
    %72 = vector.broadcast %cst_25 : f32 to vector<2x8xf32>
    %73 = arith.addf %72, %71 : vector<2x8xf32>
    %74 = arith.divf %72, %73 : vector<2x8xf32>
    %75 = vector.broadcast %13 : vector<2x8x1xf32> to vector<2x8x8xf32>
    %76 = arith.addf %36, %75 : vector<2x8x8xf32>
    %cst_26 = arith.constant dense<0xFF800000> : vector<2x8xf32>
    %77 = vector.multi_reduction <maximumf>, %76, %cst_26 [1] : vector<2x8x8xf32> to vector<2x8xf32>
    %cst_27 = arith.constant 5.000000e+00 : f32
    %78 = vector.broadcast %cst_27 : f32 to vector<2x8xf32>
    %79 = arith.mulf %77, %78 : vector<2x8xf32>
    %80 = arith.negf %79 : vector<2x8xf32>
    %81 = math.exp %80 : vector<2x8xf32>
    %cst_28 = arith.constant 1.000000e+00 : f32
    %82 = vector.broadcast %cst_28 : f32 to vector<2x8xf32>
    %83 = arith.addf %82, %81 : vector<2x8xf32>
    %84 = arith.divf %82, %83 : vector<2x8xf32>
    %cst_29 = arith.constant dense<0xFF800000> : vector<2x32xf32>
    %85 = vector.multi_reduction <maximumf>, %61, %cst_29 [1] : vector<2x8x32xf32> to vector<2x32xf32>
    %cst_30 = arith.constant dense<0xFF800000> : vector<2x32xf32>
    %86 = vector.multi_reduction <maximumf>, %64, %cst_30 [1] : vector<2x8x32xf32> to vector<2x32xf32>
    %c0_31 = arith.constant 0 : index
    %c0_32 = arith.constant 0 : index
    %c0_33 = arith.constant 0 : index
    %c0_34 = arith.constant 0 : index
    %87 = vector.load %arg5[%c0_31, %c0_32, %c0_33, %c0_34] : memref<3x2x8x8xf32, #tpu.memory_space<vmem>>, vector<1x2x8x8xf32>
    %88 = vector.shape_cast %87 : vector<1x2x8x8xf32> to vector<2x8x8xf32>
    %89 = vector.shape_cast %20 : vector<2x8x8xf32> to vector<1x2x8x8xf32>
    tpu.vector_store %arg5[%c0_31, %c0_32, %c0_33, %c0_34], %89 {strides = array<i32>} : memref<3x2x8x8xf32, #tpu.memory_space<vmem>>, vector<1x2x8x8xf32>,
    %c1 = arith.constant 1 : index
    %c0_35 = arith.constant 0 : index
    %c0_36 = arith.constant 0 : index
    %c0_37 = arith.constant 0 : index
    %90 = vector.load %arg5[%c1, %c0_35, %c0_36, %c0_37] : memref<3x2x8x8xf32, #tpu.memory_space<vmem>>, vector<1x2x8x8xf32>
    %91 = vector.shape_cast %90 : vector<1x2x8x8xf32> to vector<2x8x8xf32>
    %92 = vector.shape_cast %47 : vector<2x8x8xf32> to vector<1x2x8x8xf32>
    tpu.vector_store %arg5[%c1, %c0_35, %c0_36, %c0_37], %92 {strides = array<i32>} : memref<3x2x8x8xf32, #tpu.memory_space<vmem>>, vector<1x2x8x8xf32>,
    %c2 = arith.constant 2 : index
    %c0_38 = arith.constant 0 : index
    %c0_39 = arith.constant 0 : index
    %c0_40 = arith.constant 0 : index
    %93 = vector.load %arg5[%c2, %c0_38, %c0_39, %c0_40] : memref<3x2x8x8xf32, #tpu.memory_space<vmem>>, vector<1x2x8x8xf32>
    %94 = vector.shape_cast %93 : vector<1x2x8x8xf32> to vector<2x8x8xf32>
    %95 = vector.shape_cast %58 : vector<2x8x8xf32> to vector<1x2x8x8xf32>
    tpu.vector_store %arg5[%c2, %c0_38, %c0_39, %c0_40], %95 {strides = array<i32>} : memref<3x2x8x8xf32, #tpu.memory_space<vmem>>, vector<1x2x8x8xf32>,
    %cst_41 = arith.constant 0.000000e+00 : f32
    %96 = vector.broadcast %cst_41 : f32 to vector<2x512xf32>
    %c0_42 = arith.constant 0 : index
    %c0_43 = arith.constant 0 : index
    %97 = vector.load %arg6[%c0_42, %c0_43] : memref<2x512xf32, #tpu.memory_space<vmem>>, vector<2x512xf32>
    tpu.vector_store %arg6[%c0_42, %c0_43], %96 {strides = array<i32>} : memref<2x512xf32, #tpu.memory_space<vmem>>, vector<2x512xf32>,
    %c0_44 = arith.constant 0 : index
    %c0_45 = arith.constant 0 : index
    %98 = vector.load %arg6[%c0_44, %c0_45] : memref<2x512xf32, #tpu.memory_space<vmem>>, vector<2x32xf32>
    tpu.vector_store %arg6[%c0_44, %c0_45], %85 {strides = array<i32>} : memref<2x512xf32, #tpu.memory_space<vmem>>, vector<2x32xf32>,
    %c0_46 = arith.constant 0 : index
    %c128 = arith.constant 128 : index
    %99 = vector.load %arg6[%c0_46, %c128] : memref<2x512xf32, #tpu.memory_space<vmem>>, vector<2x32xf32>
    tpu.vector_store %arg6[%c0_46, %c128], %86 {strides = array<i32>} : memref<2x512xf32, #tpu.memory_space<vmem>>, vector<2x32xf32>,
    %c0_47 = arith.constant 0 : index
    %c256 = arith.constant 256 : index
    %100 = vector.load %arg6[%c0_47, %c256] : memref<2x512xf32, #tpu.memory_space<vmem>>, vector<2x8xf32>
    tpu.vector_store %arg6[%c0_47, %c256], %84 {strides = array<i32>} : memref<2x512xf32, #tpu.memory_space<vmem>>, vector<2x8xf32>,
    %c0_48 = arith.constant 0 : index
    %c384 = arith.constant 384 : index
    %101 = vector.load %arg6[%c0_48, %c384] : memref<2x512xf32, #tpu.memory_space<vmem>>, vector<2x8xf32>
    tpu.vector_store %arg6[%c0_48, %c384], %74 {strides = array<i32>} : memref<2x512xf32, #tpu.memory_space<vmem>>, vector<2x8xf32>,
    return
  }
  func.func @transform_0(%arg0: i32) -> (i32, i32, i32) {
    %c0_i32 = arith.constant 0 : i32
    %c0_i32_0 = arith.constant 0 : i32
    %c0_i32_1 = arith.constant 0 : i32
    return %arg0, %c0_i32, %c0_i32_0 : i32, i32, i32
  }
  func.func @transform_1(%arg0: i32) -> (i32, i32) {
    %c0_i32 = arith.constant 0 : i32
    %c0_i32_0 = arith.constant 0 : i32
    return %arg0, %c0_i32 : i32, i32
  }
  func.func @transform_2(%arg0: i32) -> (i32, i32, i32) {
    %c0_i32 = arith.constant 0 : i32
    %c0_i32_0 = arith.constant 0 : i32
    %c0_i32_1 = arith.constant 0 : i32
    return %arg0, %c0_i32, %c0_i32_0 : i32, i32, i32
  }
  func.func @transform_3(%arg0: i32) -> (i32, i32) {
    %c0_i32 = arith.constant 0 : i32
    %c0_i32_0 = arith.constant 0 : i32
    return %arg0, %c0_i32 : i32, i32
  }
  func.func @transform_4(%arg0: i32) -> (i32, i32, i32, i32) {
    %c0_i32 = arith.constant 0 : i32
    %c0_i32_0 = arith.constant 0 : i32
    %c0_i32_1 = arith.constant 0 : i32
    %c0_i32_2 = arith.constant 0 : i32
    return %c0_i32, %arg0, %c0_i32_0, %c0_i32_1 : i32, i32, i32, i32
  }
  func.func @transform_5(%arg0: i32) -> (i32, i32) {
    %c0_i32 = arith.constant 0 : i32
    %c0_i32_0 = arith.constant 0 : i32
    return %arg0, %c0_i32 : i32, i32
  }
}

</mosaic_0001>

<bundles_post_ra>
// kernel: tpu_custom_call.1
= control target key start
LH: loop header
LB: loop body
LE: loop exit
PB: predicated region body
PF: predicated region fallthrough
CT: control target
= control target key end

     0   :  { %11 = vsyncpa [#allocation3], 0  ;;  %s4282_s0 = inlined_call_operand.hbm [shape: f32[2,8,32], index: 0, kind: input, shape index: {}]   ;;  %s4283_s1 = inlined_call_operand.vmem [shape: f32[2,8], index: 1, kind: input, shape index: {}]   ;;  %s4284_s2 = inlined_call_operand.hbm [shape: f32[2,8,32], index: 2, kind: input, shape index: {}]   ;;  %s4285_s3 = inlined_call_operand.vmem [shape: f32[2,8], index: 3, kind: input, shape index: {}]   ;;  %s4286_s4 = inlined_call_operand.hbm [shape: f32[3,2,8,8], index: 4, kind: output, shape index: {0}]   ;;  %s4287_s5 = inlined_call_operand.hbm [shape: f32[2,512], index: 5, kind: output, shape index: {1}]  }
   0x1   :  { %12 = vsyncpa [#allocation6], 0 }
   0x2   :  { %13 = vsyncpa [#allocation4], 0 }
   0x3   :  { %14 = vsyncpa [#allocation9], 0  ;;  %s3818_s18 = smov [#allocation2]   ;;  %s3722_s22 = scalar_lea.hbm %s4282_s0, 256 }
   0x4   :  { %s20_s19 = sshll.u32 %s3818_s18, 4  ;;  %p3723_p0 = scmp.ne.s32.totalorder %s4282_s0, %s3722_s22  ;;  %s21_s19 = int_to_ptr.vmem [resolvable:$true] %s20_s19 }
   0x5   :  { %p3726_p1 = scmp.lt.u32.totalorder %s3722_s22, %s4282_s0 }
   0x7   :  { %p3728_p2 = pnand %p3726_p1, %p3723_p0 }
   0x9   :  { %3731 = shalt.err (!%p3728_p2)
}
   0xa   :  { %s3732_s27 = scalar_lea.vmem %s21_s19, 256  ;;  %p3737_p4 = scmp.lt.s32.totalorder %s21_s19, %s21_s19 }
   0xb   :  { %p3733_p3 = scmp.ne.s32.totalorder %s21_s19, %s3732_s27  ;;  %p3738_p5 = scmp.lt.s32.totalorder %s3732_s27, %s3732_s27 }
   0xd   :  { %p3739_p6 = por %p3738_p5, %p3737_p4 }
   0xf   :  { %p3740_p7 = pnand %p3739_p6, %p3733_p3 }
  0x11   :  { %3743 = shalt.err (!%p3740_p7)
}
  0x12   :  { %s3819_s28 = smov 128   ;;  %s3820_s29 = smov 8  }
  0x13   :  { %26 = dma.hbm_to_vmem [thread:$0]  %s4282_s0, 256, %s21_s19, [#allocation3], %s3819_s28, %s3819_s28, %s3820_s29  }
  0x14   :  { %s3821_s7 = smov [#allocation5]   ;;  %s3744_s11 = scalar_lea.hbm %s4284_s2, 256 }
  0x15   :  { %s34_s8 = sshll.u32 %s3821_s7, 4  ;;  %p3745_p8 = scmp.ne.s32.totalorder %s4284_s2, %s3744_s11  ;;  %s35_s8 = int_to_ptr.vmem [resolvable:$true] %s34_s8 }
  0x16   :  { %p3748_p9 = scmp.lt.u32.totalorder %s3744_s11, %s4284_s2 }
  0x18   :  { %p3750_p10 = pnand %p3748_p9, %p3745_p8 }
  0x1a   :  { %3753 = shalt.err (!%p3750_p10)
}
  0x1b   :  { %s3754_s16 = scalar_lea.vmem %s35_s8, 256  ;;  %p3759_p12 = scmp.lt.s32.totalorder %s35_s8, %s35_s8 }
  0x1c   :  { %p3755_p11 = scmp.ne.s32.totalorder %s35_s8, %s3754_s16  ;;  %p3760_p13 = scmp.lt.s32.totalorder %s3754_s16, %s3754_s16 }
  0x1e   :  { %p3761_p0 = por %p3760_p13, %p3759_p12 }
  0x20   :  { %p3762_p1 = pnand %p3761_p0, %p3755_p11 }
  0x22   :  { %3765 = shalt.err (!%p3762_p1)
}
  0x23   :  { %40 = dma.hbm_to_vmem [thread:$0]  %s4284_s2, 256, %s35_s8, [#allocation6], %s3819_s28, %s3819_s28, %s3820_s29  }
  0x24   :  { %3810 = dma.done.wait [#allocation3], 256  }
  0x25   :  { %3811 = vsyncadd [#allocation3], 4294967040 }
  0x26   :  { %3812 = dma.done.wait [#allocation6], 256  }
  0x27   :  { %3813 = vsyncadd [#allocation6], 4294967040  ;;  %v61_v0 = vlaneseq  ;;  %v3822_v3 = vmov 0.0   ;;  %vm3823_vm0 = vmmov 0   ;;  %v3912_v5 = vld [vmem:[%s4285_s3] sm:$0x3] }
  0x28   :  { %3455 = vmatprep.subr.mxu1 %v3822_v3  ;;  %3121 = vst [vmem:[#allocation8] sm:$0xff] %v3822_v3  ;;  %3425 = vmatprep.subr.mxu0 %v3822_v3  ;;  %v3917_v6 = vld [vmem:[%s4283_s1] sm:$0x3]  ;;  %v52_v11 = vld [vmem:[#allocation5 + $0x8] sm:$0xff]  ;;  %v50_v12 = vld [vmem:[#allocation2 + $0x8] sm:$0xff]  ;;  %vm128_vm1 = vcmask 261120  }
  0x29   :  { %v3894_v1 = vshrl.u32 %v61_v0, 7  ;;  %3457 = vmatprep.mubr.msk.f32.mxu1 %vm3823_vm0, %v3822_v3  ;;  %3427 = vmatprep.mubr.msk.f32.mxu0 %vm3823_vm0, %v3822_v3  ;;  %v51_v17 = vld [vmem:[#allocation5] sm:$0xff]  ;;  %v49_v18 = vld [vmem:[#allocation2] sm:$0xff]  ;;  %v3824_v49 = vmov 1966171168   ;;  %v3347_v52 = vadd.f32 -1.0, %v3917_v6 }
  0x2a   :  { %v59_v50 = vunpack.c.l.s4 %v3824_v49  ;;  %vm1106_vm2 = vcmask 64512   ;;  %vm1071_vm3 = vcmask 1041409   ;;  %vm1074_vm4 = vcmask 1043459   ;;  %s3831_s1 = smov [#allocation7]  }
  0x2b   :  { %v3897_v2 = vsub.s32 1, %v3894_v1  ;;  %v3903_v4 = vsub.s32 0, %v3894_v1  ;;  %v56_v54 = vmul.f32 10000.0, %v3347_v52  ;;  %vm1078_vm5 = vcmask 1045509   ;;  %s3320_s3 = sshll.u32 %s3831_s1, 4  ;;  %s3321_s3 = int_to_ptr.vmem [resolvable:$true] %s3320_s3 }
  0x2c   :  { %v60_v51 = vunpack.c.0.s8 %v59_v50  ;;  %vm1082_vm6 = vcmask 1047559   ;;  %vm3197_vm7 = vcmask 58368   ;;  %vm3146_vm8 = vcmask 254976   ;;  %s3766_s21 = scalar_lea.vmem %s3321_s3, 768  ;;  %p3771_p3 = scmp.lt.s32.totalorder %s3321_s3, %s3321_s3 }
  0x2d   :  { %v120_v7 = vrot.slane %v3912_v5, %v3897_v2  ;;  %v106_v8 = vrot.slane %v3917_v6, %v3897_v2  ;;  %v113_v9 = vrot.slane %v3912_v5, %v3903_v4  ;;  %v99_v10 = vrot.slane %v3917_v6, %v3903_v4  ;;  %p3767_p2 = scmp.ne.s32.totalorder %s3321_s3, %s3766_s21  ;;  %p3772_p4 = scmp.lt.s32.totalorder %s3766_s21, %s3766_s21 }
  0x2e   :  { %v63_v53 = vsub.s32 %v60_v51, %v3894_v1 }
  0x2f   :  { %122 = vbcast.lane.b32.xlu0 %v120_v7, 256  ;;  %108 = vbcast.lane.b32.xlu1 %v106_v8, 256  ;;  %p3773_p5 = por %p3772_p4, %p3771_p3 }
  0x30   :  { %v64_v55 = vrot.slane %v56_v54, %v63_v53 }
  0x31   :  { %p3774_p6 = pnand %p3773_p5, %p3767_p2 }
  0x32   :  { %v65_v56 = vcombine.high %v64_v55, %v64_v55  ;;  %v72_v59 = vrot.slane %v64_v55, %v63_v53 }
  0x33   :  { %115 = vbcast.lane.b32.xlu0 %v113_v9, 256  ;;  %101 = vbcast.lane.b32.xlu1 %v99_v10, 256 }
  0x34   :  { %v79_v57 = vrot.slane %v65_v56, %v63_v53  ;;  %v4025_v63 = vrot.slane %v72_v59, %v3903_v4 }
  0x36   :  { %v4016_v58 = vrot.slane %v79_v57, %v3903_v4 }
  0xa1   :  { %v3927_v13 = vpop.permute.xlu0 %122  ;;  %v3929_v14 = vpop.permute.xlu1 %108 }
  0xa2   :  { %v3932_v15 = vmul.f32 %v3927_v13, %v52_v11  ;;  %v3935_v16 = vmul.f32 %v3929_v14, %v50_v12  ;;  %v3348_v11 = vadd.f32 -1.0, %v3912_v5 }
  0xa4   :  { %v582_v19 = vsel %vm128_vm1, %v3932_v15, 0  ;;  %v585_v20 = vsel %vm128_vm1, %v3935_v16, 0  ;;  %v3998_v47 = vand.u32 4294901760, %v3935_v16  ;;  %v81_v12 = vmul.f32 10000.0, %v3348_v11 }
  0xa5   :  { %v3941_v21 = vand.u32 4294901760, %v582_v19  ;;  %v3943_v22 = vpop.permute.xlu0 %115  ;;  %v3945_v23 = vpop.permute.xlu1 %101  ;;  %v588_v24 = vand.u32 4294901760, %v585_v20 }
  0xa6   :  { %v3948_v25 = vmul.f32 %v3943_v22, %v51_v17  ;;  %v3951_v26 = vmul.f32 %v3945_v23, %v49_v18  ;;  %v85_v17 = vrot.slane %v81_v12, %v3903_v4  ;;  %v92_v18 = vrot.slane %v81_v12, %v3897_v2 }
  0xa7   :  { %3456 = vmatpush3.xpose.msra.mxu1 %v588_v24  ;;  %v665_v27 = vsub.f32 %v585_v20, %v588_v24  ;;  %v654_v28 = vsub.f32 %v582_v19, %v3941_v21 }
  0xa8   :  { %v130_v29 = vsel %vm128_vm1, %v3948_v25, 0  ;;  %3460 = vmatprep.subr.mxu1 %v3822_v3  ;;  %v133_v30 = vsel %vm128_vm1, %v3951_v26, 0  ;;  %v4006_v48 = vand.u32 4294901760, %v3951_v26 }
  0xa9   :  { %v3959_v31 = vand.u32 4294901760, %v130_v29  ;;  %v136_v32 = vand.u32 4294901760, %v133_v30  ;;  %v655_v33 = vand.u32 4294901760, %v654_v28  ;;  %v666_v34 = vand.u32 4294901760, %v665_v27 }
  0xab   :  { %3426 = vmatpush3.xpose.msra.mxu0 %v136_v32  ;;  %v213_v35 = vsub.f32 %v133_v30, %v136_v32  ;;  %v656_v36 = vsub.f32 %v654_v28, %v655_v33  ;;  %v667_v37 = vsub.f32 %v665_v27, %v666_v34  ;;  %v202_v38 = vsub.f32 %v130_v29, %v3959_v31 }
  0xac   :  { %3430 = vmatprep.subr.mxu0 %v3822_v3 }
  0xad   :  { %v657_v39 = vand.u32 4294901760, %v656_v36  ;;  %v668_v40 = vand.u32 4294901760, %v667_v37  ;;  %v203_v41 = vand.u32 4294901760, %v202_v38  ;;  %v214_v42 = vand.u32 4294901760, %v213_v35 }
  0xaf   :  { %3458 = vmatmul.mubr.f32.vlgmr.msra.gmra.mrb[0].mxu1 %v657_v39  ;;  %v204_v43 = vsub.f32 %v202_v38, %v203_v41  ;;  %v215_v44 = vsub.f32 %v213_v35, %v214_v42 }
  0xb0   :  { %3461 = vmatpush3.xpose.msra.mxu1 %v668_v40  ;;  %3462 = vmatprep.mubr.msk.f32.mxu1 %vm3823_vm0, %v3822_v3 }
  0xb1   :  { %v205_v45 = vand.u32 4294901760, %v204_v43  ;;  %v216_v46 = vand.u32 4294901760, %v215_v44  ;;  %3465 = vmatprep.subr.mxu1 %v3822_v3 }
  0xb3   :  { %3428 = vmatmul.mubr.f32.vlgmr.msra.gmra.mrb[0].mxu0 %v205_v45 }
  0xb4   :  { %3431 = vmatpush3.xpose.msra.mxu0 %v216_v46  ;;  %3432 = vmatprep.mubr.msk.f32.mxu0 %vm3823_vm0, %v3822_v3 }
  0xb5   :  { %3435 = vmatprep.subr.mxu0 %v3822_v3 }
  0xb7   :  { %3463 = vmatmul.mubr.f32.vlgmr.msra.gmra.mrb[0].mxu1 %v3941_v21 }
  0xb8   :  { %3466 = vmatpush3.xpose.msra.mxu1 %v665_v27  ;;  %3467 = vmatprep.mubr.msk.f32.mxu1 %vm3823_vm0, %v3822_v3 }
  0xb9   :  { %3470 = vmatprep.subr.mxu1 %v3822_v3 }
  0xbb   :  { %3433 = vmatmul.mubr.f32.vlgmr.msra.gmra.mrb[0].mxu0 %v3959_v31 }
  0xbc   :  { %3436 = vmatpush3.xpose.msra.mxu0 %v213_v35  ;;  %3437 = vmatprep.mubr.msk.f32.mxu0 %vm3823_vm0, %v3822_v3 }
  0xbd   :  { %3440 = vmatprep.subr.mxu0 %v3822_v3 }
  0xbf   :  { %3468 = vmatmul.mubr.f32.vlgmr.msra.gmra.mrb[0].mxu1 %v654_v28 }
  0xc0   :  { %3471 = vmatpush3.xpose.msra.mxu1 %v588_v24  ;;  %3472 = vmatprep.mubr.msk.f32.mxu1 %vm3823_vm0, %v3822_v3 }
  0xc1   :  { %3475 = vmatprep.subr.mxu1 %v3822_v3 }
  0xc3   :  { %3438 = vmatmul.mubr.f32.vlgmr.msra.gmra.mrb[0].mxu0 %v202_v38 }
  0xc4   :  { %3441 = vmatpush3.xpose.msra.mxu0 %v136_v32  ;;  %3442 = vmatprep.mubr.msk.f32.mxu0 %vm3823_vm0, %v3822_v3 }
  0xc5   :  { %3445 = vmatprep.subr.mxu0 %v3822_v3 }
  0xc7   :  { %3473 = vmatmul.mubr.f32.vlgmr.msra.gmra.mrb[0].mxu1 %v655_v33 }
  0xc8   :  { %3476 = vmatpush3.xpose.msra.mxu1 %v666_v34  ;;  %3477 = vmatprep.mubr.msk.f32.mxu1 %vm3823_vm0, %v3822_v3 }
  0xc9   :  { %3480 = vmatprep.subr.mxu1 %v3822_v3 }
  0xcb   :  { %3443 = vmatmul.mubr.f32.vlgmr.msra.gmra.mrb[0].mxu0 %v203_v41 }
  0xcc   :  { %3446 = vmatpush3.xpose.msra.mxu0 %v214_v42  ;;  %3447 = vmatprep.mubr.msk.f32.mxu0 %vm3823_vm0, %v3822_v3 }
  0xcd   :  { %3450 = vmatprep.subr.mxu0 %v3822_v3 }
  0xcf   :  { %3478 = vmatmul.mubr.f32.vlgmr.msra.gmra.mrb[0].mxu1 %v3941_v21 }
  0xd0   :  { %3481 = vmatpush3.xpose.msra.mxu1 %v588_v24  ;;  %3482 = vmatprep.mubr.msk.f32.mxu1 %vm3823_vm0, %v3822_v3 }
  0xd1   :  { %3515 = vmatprep.subr.mxu1 %v3822_v3 }
  0xd3   :  { %3448 = vmatmul.mubr.f32.vlgmr.msra.gmra.mrb[0].mxu0 %v3959_v31 }
  0xd4   :  { %3451 = vmatpush3.xpose.msra.mxu0 %v136_v32  ;;  %3452 = vmatprep.mubr.msk.f32.mxu0 %vm3823_vm0, %v3822_v3 }
  0xd5   :  { %3485 = vmatprep.subr.mxu0 %v3822_v3 }
  0xd7   :  { %3483 = vmatmul.mubr.f32.vlgmr.msra.gmra.mrb[0].mxu1 %v3941_v21 }
  0xd8   :  { %3516 = vmatpush3.msra.mxu1 %v3998_v47  ;;  %3517 = vmatprep.mubr.msk.f32.mxu1 %vm3823_vm0, %v3822_v3 }
  0xd9   :  { %3520 = vmatprep.subr.mxu1 %v3822_v3 }
  0xdb   :  { %3453 = vmatmul.mubr.f32.vlgmr.msra.gmra.mrb[0].mxu0 %v3959_v31 }
  0xdc   :  { %3486 = vmatpush3.msra.mxu0 %v4006_v48  ;;  %3487 = vmatprep.mubr.msk.f32.mxu0 %vm3823_vm0, %v3822_v3 }
  0xdd   :  { %3490 = vmatprep.subr.mxu0 %v3822_v3 }
 0x1aa   :  { %v4018_v60 = vpop.f32.mrb[0].mxu1 }
 0x1ab   :  { %3114 = vst.msk [vmem:[#allocation7 + $0x8] sm:$0xff] %vm1106_vm2, %v4018_v60  ;;  %v3484_v61 = vpop.f32.mrb[1].mxu1  ;;  %v1105_v62 = vadd.f32 %v4016_v58, %v4018_v60 }
 0x1ad   :  { %v1110_v6 = vsel %vm1106_vm2, %v1105_v62, -inf }
 0x1ae   :  { %1111 = vmax.xlane.f32.xlu0 %v1110_v6  ;;  %v4028_v7 = vpop.f32.mrb[0].mxu0 }
 0x1af   :  { %3113 = vst.msk [vmem:[#allocation7] sm:$0xff] %vm1106_vm2, %v4028_v7  ;;  %v3454_v8 = vpop.f32.mrb[1].mxu0  ;;  %v1104_v9 = vadd.f32 %v4025_v63, %v4028_v7 }
 0x1b1   :  { %v1107_v10 = vsel %vm1106_vm2, %v1104_v9, -inf }
 0x1b2   :  { %1108 = vmax.xlane.f32.xlu1 %v1107_v10 }
 0x1c3   :  { %87 = vbcast.lane.b32.xlu1 %v85_v17, 256 }
 0x1c4   :  { %94 = vbcast.lane.b32.xlu0 %v92_v18, 256 }
 0x23b   :  { %v1112_v19 = vpop.xlane.xlu0 %1111 }
 0x23c   :  { %v1114_v20 = vsub.f32 %v1105_v62, %v1112_v19 }
 0x23e   :  { %v1117_v21 = vmul.f32 1.442695, %v1114_v20 }
 0x23f   :  { %v4038_v24 = vpop.permute.xlu0 %94  ;;  %v1109_v27 = vpop.xlane.xlu1 %1108 }
 0x240   :  { %3682 = vpow2.f32 %v1117_v21  ;;  %v1130_v28 = vadd.f32 %v4018_v60, %v4038_v24  ;;  %v1113_v29 = vsub.f32 %v1104_v9, %v1109_v27 }
 0x242   :  { %v1138_v5 = vsel %vm1106_vm2, %v1130_v28, -inf  ;;  %v1115_v30 = vmul.f32 1.442695, %v1113_v29  ;;  %v1033_v29 = vmul.f32 %v3951_v26, %v3951_v26 }
 0x243   :  { %v1139_v31 = vrot.slane %v1138_v5, 4  ;;  %v4043_v4 = vpop.permute.xlu1 %87 }
 0x244   :  { %3684 = vpow2.f32 %v1115_v30  ;;  %v1129_v2 = vadd.f32 %v4028_v7, %v4043_v4  ;;  %v1045_v30 = vmul.f32 %v3948_v25, %v3948_v25 }
 0x245   :  { %v1140_v32 = vmax.f32 %v1138_v5, %v1139_v31  ;;  %v1035_v5 = vsel %vm128_vm1, %v1033_v29, 0.0  ;;  %v1034_v31 = vmul.f32 %v3935_v16, %v3935_v16 }
 0x246   :  { %v1131_v33 = vsel %vm1106_vm2, %v1129_v2, -inf }
 0x247   :  { %v1141_v34 = vrot.slane %v1140_v32, 2  ;;  %v1132_v35 = vrot.slane %v1131_v33, 4 }
 0x249   :  { %v1142_v36 = vmax.f32 %v1140_v32, %v1141_v34  ;;  %v1133_v37 = vmax.f32 %v1131_v33, %v1132_v35  ;;  %v1038_v32 = vsel %vm128_vm1, %v1034_v31, 0.0  ;;  %v1046_v33 = vmul.f32 %v3932_v15, %v3932_v15 }
 0x24a   :  { %v3683_v38 = vpop.eup %3682 }
 0x24b   :  { %v1143_v39 = vrot.slane %v1142_v36, 1  ;;  %v1134_v40 = vrot.slane %v1133_v37, 2  ;;  %v1122_v41 = vsel %vm1106_vm2, %v3683_v38, 0.0  ;;  %v1050_v34 = vsel %vm128_vm1, %v1046_v33, 0.0 }
 0x24c   :  { %1123 = vadd.xlane.f32.xlu0 %v1122_v41 }
 0x24d   :  { %v1144_v42 = vmax.f32 %v1142_v36, %v1143_v39  ;;  %v1135_v43 = vmax.f32 %v1133_v37, %v1134_v40  ;;  %v1699_v40 = vsub.f32 %v3935_v16, %v3998_v47 }
 0x24e   :  { %v3685_v44 = vpop.eup %3684 }
 0x24f   :  { %v1146_v45 = vsub.f32 %v1130_v28, %v1144_v42  ;;  %v1136_v46 = vrot.slane %v1135_v43, 1  ;;  %v1119_v49 = vsel %vm1106_vm2, %v3685_v44, 0.0 }
 0x250   :  { %1120 = vadd.xlane.f32.xlu1 %v1119_v49  ;;  %v1250_v49 = vsub.f32 %v3951_v26, %v4006_v48 }
 0x251   :  { %v1149_v50 = vmul.f32 1.442695, %v1146_v45  ;;  %v1137_v51 = vmax.f32 %v1135_v43, %v1136_v46  ;;  %v1700_v46 = vand.u32 4294901760, %v1699_v40 }
 0x253   :  { %3686 = vpow2.f32 %v1149_v50  ;;  %v1145_v52 = vsub.f32 %v1129_v2, %v1137_v51  ;;  %v1047_v2 = vsel %vm128_vm1, %v1045_v30, 0.0 }
 0x255   :  { %v1147_v53 = vmul.f32 1.442695, %v1145_v52  ;;  %v1701_v52 = vsub.f32 %v1699_v40, %v1700_v46 }
 0x257   :  { %3688 = vpow2.f32 %v1147_v53  ;;  %v1251_v53 = vand.u32 4294901760, %v1250_v49 }
 0x25d   :  { %v3687_v54 = vpop.eup %3686 }
 0x25e   :  { %v1158_v55 = vsel %vm1106_vm2, %v3687_v54, 0.0 }
 0x25f   :  { %v1159_v56 = vrot.slane %v1158_v55, 4 }
 0x261   :  { %v3689_v57 = vpop.eup %3688  ;;  %v1160_v59 = vadd.f32 %v1159_v56, %v1158_v55 }
 0x262   :  { %v1151_v61 = vsel %vm1106_vm2, %v3689_v57, 0.0 }
 0x263   :  { %v1152_v62 = vrot.slane %v1151_v61, 4  ;;  %v1161_v6 = vrot.slane %v1160_v59, 2 }
 0x265   :  { %v1153_v8 = vadd.f32 %v1152_v62, %v1151_v61  ;;  %v1162_v9 = vadd.f32 %v1161_v6, %v1160_v59  ;;  %v1252_v59 = vsub.f32 %v1250_v49, %v1251_v53 }
 0x267   :  { %v1163_v10 = vrot.slane %v1162_v9, 1  ;;  %v1154_v11 = vrot.slane %v1153_v8, 2  ;;  %v1253_v62 = vand.u32 4294901760, %v1252_v59 }
 0x269   :  { %v1164_v12 = vadd.f32 %v1163_v10, %v1162_v9  ;;  %v1155_v17 = vadd.f32 %v1154_v11, %v1153_v8 }
 0x26b   :  { %3690 = vrcp.f32 %v1164_v12  ;;  %v1156_v18 = vrot.slane %v1155_v17, 1  ;;  %v4110_v12 = vand.u32 4294901760, %v3932_v15 }
 0x26d   :  { %v1157_v19 = vadd.f32 %v1156_v18, %v1155_v17 }
 0x26f   :  { %3692 = vrcp.f32 %v1157_v19  ;;  %v4121_v19 = vand.u32 4294901760, %v3948_v25 }
 0x271   :  { %v2182_v29 = vsub.f32 %v3948_v25, %v4121_v19 }
 0x273   :  { %v2183_v30 = vand.u32 4294901760, %v2182_v29 }
 0x275   :  { %v3691_v20 = vpop.eup %3690 }
 0x276   :  { %v1168_v21 = vmul.f32 %v3691_v20, %v3687_v54  ;;  %v2663_v20 = vsub.f32 %v3932_v15, %v4110_v12 }
 0x278   :  { %3120 = vst.msk [vmem:[#allocation7 + $0x28] sm:$0xff] %vm1106_vm2, %v1168_v21 }
 0x279   :  { %v3693_v27 = vpop.eup %3692  ;;  %2550 = vxpose.xlu0.b32.start.end [1/1] (short) (narrow) %v1168_v21, 8 }
 0x27a   :  { %v1166_v28 = vmul.f32 %v3693_v27, %v3689_v57  ;;  %v1702_v57 = vand.u32 4294901760, %v1701_v52 }
 0x27c   :  { %3119 = vst.msk [vmem:[#allocation7 + $0x20] sm:$0xff] %vm1106_vm2, %v1166_v28 }
 0x283   :  { %2069 = vxpose.xlu1.b32.start.end [1/1] (short) (narrow) %v1166_v28, 8  ;;  %v2664_v28 = vand.u32 4294901760, %v2663_v20 }
 0x2a6   :  { %1036 = vadd.xlane.f32.xlu0 %v1035_v5 }
 0x2aa   :  { %1048 = vadd.xlane.f32.xlu0 %v1047_v2  ;;  %1039 = vadd.xlane.f32.xlu1 %v1038_v32 }
 0x2ae   :  { %1051 = vadd.xlane.f32.xlu0 %v1050_v34 }
 0x2d9   :  { %v1124_v35 = vpop.xlane.xlu0 %1123 }
 0x2da   :  { %3694 = vrcp.f32 %v1124_v35 }
 0x2dd   :  { %v1121_v36 = vpop.xlane.xlu1 %1120 }
 0x2de   :  { %3696 = vrcp.f32 %v1121_v36 }
 0x2e4   :  { %v3695_v37 = vpop.eup %3694 }
 0x2e5   :  { %v1128_v39 = vmul.f32 %v3695_v37, %v3683_v38 }
 0x2e7   :  { %3117 = vst.msk [vmem:[#allocation7 + $0x18] sm:$0xff] %vm1106_vm2, %v1128_v39  ;;  %v1619_v41 = vsel %vm1106_vm2, %v1128_v39, 0 }
 0x2e8   :  { %v3697_v42 = vpop.eup %3696  ;;  %v4070_v43 = vand.u32 4294901760, %v1619_v41 }
 0x2e9   :  { %v1126_v45 = vmul.f32 %v3697_v42, %v3685_v44 }
 0x2ea   :  { %v1688_v50 = vsub.f32 %v1619_v41, %v4070_v43 }
 0x2eb   :  { %3116 = vst.msk [vmem:[#allocation7 + $0x10] sm:$0xff] %vm1106_vm2, %v1126_v45  ;;  %v1170_v38 = vsel %vm1106_vm2, %v1126_v45, 0 }
 0x2ec   :  { %v1689_v51 = vand.u32 4294901760, %v1688_v50  ;;  %v4077_v16 = vand.u32 4294901760, %v1170_v38 }
 0x2ee   :  { %v1690_v54 = vsub.f32 %v1688_v50, %v1689_v51  ;;  %v1239_v55 = vsub.f32 %v1170_v38, %v4077_v16 }
 0x2f0   :  { %v1691_v56 = vand.u32 4294901760, %v1690_v54  ;;  %v1240_v44 = vand.u32 4294901760, %v1239_v55 }
 0x2f2   :  { %3518 = vmatmul.mubr.f32.vlgmr.msra.gmra.mrb[2].mxu1 %v1691_v56  ;;  %v1241_v26 = vsub.f32 %v1239_v55, %v1240_v44 }
 0x2f3   :  { %3521 = vmatpush3.msra.mxu1 %v1702_v57  ;;  %3522 = vmatprep.mubr.msk.f32.mxu1 %vm3823_vm0, %v3822_v3 }
 0x2f4   :  { %v1242_v61 = vand.u32 4294901760, %v1241_v26  ;;  %3525 = vmatprep.subr.mxu1 %v3822_v3 }
 0x2f6   :  { %3488 = vmatmul.mubr.f32.vlgmr.msra.gmra.mrb[2].mxu0 %v1242_v61 }
 0x2f7   :  { %3491 = vmatpush3.msra.mxu0 %v1253_v62  ;;  %3492 = vmatprep.mubr.msk.f32.mxu0 %vm3823_vm0, %v3822_v3 }
 0x2f8   :  { %3495 = vmatprep.subr.mxu0 %v3822_v3 }
 0x2f9   :  { %v2566_v6 = vpop.trf.xlu0 }
 0x2fa   :  { %3523 = vmatmul.mubr.f32.vlgmr.msra.gmra.mrb[2].mxu1 %v4070_v43  ;;  %v2583_v8 = vsel %vm1106_vm2, %v2566_v6, 0 }
 0x2fb   :  { %3526 = vmatpush3.msra.mxu1 %v1699_v40  ;;  %3527 = vmatprep.mubr.msk.f32.mxu1 %vm3823_vm0, %v3822_v3  ;;  %v4103_v10 = vand.u32 4294901760, %v2583_v8 }
 0x2fc   :  { %3530 = vmatprep.subr.mxu1 %v3822_v3 }
 0x2fd   :  { %v4113_v17 = vsub.f32 %v2583_v8, %v4103_v10 }
 0x2fe   :  { %3493 = vmatmul.mubr.f32.vlgmr.msra.gmra.mrb[2].mxu0 %v4077_v16 }
 0x2ff   :  { %3496 = vmatpush3.msra.mxu0 %v1250_v49  ;;  %3497 = vmatprep.mubr.msk.f32.mxu0 %vm3823_vm0, %v3822_v3  ;;  %v2653_v21 = vand.u32 4294901760, %v4113_v17 }
 0x300   :  { %3500 = vmatprep.subr.mxu0 %v3822_v3 }
 0x301   :  { %v2654_v15 = vsub.f32 %v4113_v17, %v2653_v21 }
 0x302   :  { %3528 = vmatmul.mubr.f32.vlgmr.msra.gmra.mrb[2].mxu1 %v1688_v50 }
 0x303   :  { %3531 = vmatpush3.msra.mxu1 %v3998_v47  ;;  %3532 = vmatprep.mubr.msk.f32.mxu1 %vm3823_vm0, %v3822_v3  ;;  %v2085_v9 = vpop.trf.xlu1  ;;  %v2655_v31 = vand.u32 4294901760, %v2654_v15 }
 0x304   :  { %3535 = vmatprep.subr.mxu1 %v3822_v3  ;;  %v2102_v11 = vsel %vm1106_vm2, %v2085_v9, 0 }
 0x305   :  { %v4115_v18 = vand.u32 4294901760, %v2102_v11 }
 0x306   :  { %3498 = vmatmul.mubr.f32.vlgmr.msra.gmra.mrb[2].mxu0 %v1239_v55 }
 0x307   :  { %3501 = vmatpush3.msra.mxu0 %v4006_v48  ;;  %3502 = vmatprep.mubr.msk.f32.mxu0 %vm3823_vm0, %v3822_v3  ;;  %v4128_v27 = vsub.f32 %v2102_v11, %v4115_v18 }
 0x308   :  { %3505 = vmatprep.subr.mxu0 %v3822_v3 }
 0x309   :  { %v2172_v5 = vand.u32 4294901760, %v4128_v27 }
 0x30a   :  { %3533 = vmatmul.mubr.f32.vlgmr.msra.gmra.mrb[2].mxu1 %v1689_v51 }
 0x30b   :  { %3536 = vmatpush3.msra.mxu1 %v1700_v46  ;;  %3537 = vmatprep.mubr.msk.f32.mxu1 %vm3823_vm0, %v3822_v3  ;;  %v2173_v2 = vsub.f32 %v4128_v27, %v2172_v5 }
 0x30c   :  { %3540 = vmatprep.subr.mxu1 %v3822_v3 }
 0x30d   :  { %v2174_v32 = vand.u32 4294901760, %v2173_v2 }
 0x30e   :  { %3503 = vmatmul.mubr.f32.vlgmr.msra.gmra.mrb[2].mxu0 %v1240_v44 }
 0x30f   :  { %3506 = vmatpush3.msra.mxu0 %v1251_v53  ;;  %3507 = vmatprep.mubr.msk.f32.mxu0 %vm3823_vm0, %v3822_v3 }
 0x310   :  { %3510 = vmatprep.subr.mxu0 %v3822_v3 }
 0x312   :  { %3538 = vmatmul.mubr.f32.vlgmr.msra.gmra.mrb[2].mxu1 %v4070_v43 }
 0x313   :  { %3541 = vmatpush3.msra.mxu1 %v3998_v47  ;;  %3542 = vmatprep.mubr.msk.f32.mxu1 %vm3823_vm0, %v3822_v3  ;;  %v2665_v47 = vsub.f32 %v2663_v20, %v2664_v28 }
 0x314   :  { %3575 = vmatprep.subr.mxu1 %v3822_v3 }
 0x315   :  { %v2666_v25 = vand.u32 4294901760, %v2665_v47 }
 0x316   :  { %3508 = vmatmul.mubr.f32.vlgmr.msra.gmra.mrb[2].mxu0 %v4077_v16 }
 0x317   :  { %3511 = vmatpush3.msra.mxu0 %v4006_v48  ;;  %3512 = vmatprep.mubr.msk.f32.mxu0 %vm3823_vm0, %v3822_v3  ;;  %v2184_v48 = vsub.f32 %v2182_v29, %v2183_v30 }
 0x318   :  { %3545 = vmatprep.subr.mxu0 %v3822_v3 }
 0x319   :  { %v2185_v33 = vand.u32 4294901760, %v2184_v48 }
 0x31a   :  { %3543 = vmatmul.mubr.f32.vlgmr.msra.gmra.mrb[2].mxu1 %v4070_v43  ;;  %v1062_v43 = vand.u32 127, %v61_v0 }
 0x31b   :  { %3576 = vmatpush3.msra.mxu1 %v4110_v12  ;;  %3577 = vmatprep.mubr.msk.f32.mxu1 %vm3823_vm0, %v3822_v3 }
 0x31c   :  { %3580 = vmatprep.subr.mxu1 %v3822_v3  ;;  %v4190_v45 = vsub.s32 %v1062_v43, %v3894_v1 }
 0x31e   :  { %3513 = vmatmul.mubr.f32.vlgmr.msra.gmra.mrb[2].mxu0 %v4077_v16  ;;  %3578 = vmatmul.mubr.f32.vlgmr.msra.gmra.mrb[4].mxu1 %v2655_v31 }
 0x31f   :  { %3546 = vmatpush3.msra.mxu0 %v4121_v19  ;;  %3581 = vmatpush3.msra.mxu1 %v2666_v25 }
 0x320   :  { %3547 = vmatprep.mubr.msk.f32.mxu0 %vm3823_vm0, %v3822_v3  ;;  %3550 = vmatprep.subr.mxu0 %v3822_v3 }
 0x321   :  { %3582 = vmatprep.mubr.msk.f32.mxu1 %vm3823_vm0, %v3822_v3  ;;  %3585 = vmatprep.subr.mxu1 %v3822_v3 }
 0x322   :  { %3548 = vmatmul.mubr.f32.vlgmr.msra.gmra.mrb[4].mxu0 %v2174_v32 }
 0x323   :  { %3551 = vmatpush3.msra.mxu0 %v2185_v33  ;;  %3552 = vmatprep.mubr.msk.f32.mxu0 %vm3823_vm0, %v3822_v3 }
 0x324   :  { %3555 = vmatprep.subr.mxu0 %v3822_v3 }
 0x326   :  { %3583 = vmatmul.mubr.f32.vlgmr.msra.gmra.mrb[4].mxu1 %v4103_v10 }
 0x327   :  { %3586 = vmatpush3.msra.mxu1 %v2663_v20  ;;  %3587 = vmatprep.mubr.msk.f32.mxu1 %vm3823_vm0, %v3822_v3 }
 0x328   :  { %3590 = vmatprep.subr.mxu1 %v3822_v3 }
 0x32a   :  { %3553 = vmatmul.mubr.f32.vlgmr.msra.gmra.mrb[4].mxu0 %v4115_v18 }
 0x32b   :  { %3556 = vmatpush3.msra.mxu0 %v2182_v29  ;;  %3557 = vmatprep.mubr.msk.f32.mxu0 %vm3823_vm0, %v3822_v3  ;;  %v3825_v29 = vmov 1983009808  }
 0x32c   :  { %3560 = vmatprep.subr.mxu0 %v3822_v3  ;;  %v3125_v15 = vunpack.c.l.s4 %v3825_v29 }
 0x32e   :  { %3588 = vmatmul.mubr.f32.vlgmr.msra.gmra.mrb[4].mxu1 %v4113_v17 }
 0x32f   :  { %3591 = vmatpush3.msra.mxu1 %v4110_v12  ;;  %3592 = vmatprep.mubr.msk.f32.mxu1 %vm3823_vm0, %v3822_v3 }
 0x330   :  { %3595 = vmatprep.subr.mxu1 %v3822_v3 }
 0x332   :  { %3558 = vmatmul.mubr.f32.vlgmr.msra.gmra.mrb[4].mxu0 %v4128_v27 }
 0x333   :  { %3561 = vmatpush3.msra.mxu0 %v4121_v19  ;;  %v1037_v34 = vpop.xlane.xlu0 %1036  ;;  %3562 = vmatprep.mubr.msk.f32.mxu0 %vm3823_vm0, %v3822_v3 }
 0x334   :  { %v1041_v35 = vmax.f32 %v1037_v34, 1e-07  ;;  %3565 = vmatprep.subr.mxu0 %v3822_v3 }
 0x336   :  { %3593 = vmatmul.mubr.f32.vlgmr.msra.gmra.mrb[4].mxu1 %v2653_v21  ;;  %3698 = vrsqrt.f32 %v1041_v35 }
 0x337   :  { %3596 = vmatpush3.msra.mxu1 %v2664_v28  ;;  %v1049_v36 = vpop.xlane.xlu0 %1048  ;;  %v1040_v37 = vpop.xlane.xlu1 %1039  ;;  %3597 = vmatprep.mubr.msk.f32.mxu1 %vm3823_vm0, %v3822_v3 }
 0x338   :  { %v1053_v39 = vmax.f32 %v1049_v36, 1e-07  ;;  %v1042_v40 = vmax.f32 %v1040_v37, 1e-07  ;;  %3600 = vmatprep.subr.mxu1 %v3822_v3  ;;  %v3826_v36 = vmov 0  }
 0x339   :  { %3680 = vset.pattern.permute.xlu1 %v3826_v36  ;;  %3681 = vset.pattern.permute.xlu0 %v3826_v36 }
 0x33a   :  { %3700 = vrsqrt.f32 %v1053_v39  ;;  %3563 = vmatmul.mubr.f32.vlgmr.msra.gmra.mrb[4].mxu0 %v2172_v5  ;;  %v3126_v5 = vunpack.c.0.s8 %v3125_v15 }
 0x33b   :  { %3566 = vmatpush3.msra.mxu0 %v2183_v30  ;;  %v1052_v41 = vpop.xlane.xlu0 %1051  ;;  %3567 = vmatprep.mubr.msk.f32.mxu0 %vm3823_vm0, %v3822_v3  ;;  %3702 = vrsqrt.f32 %v1042_v40 }
 0x33c   :  { %v1054_v42 = vmax.f32 %v1052_v41, 1e-07  ;;  %3570 = vmatprep.subr.mxu0 %v3822_v3  ;;  %v4211_v30 = vsub.s32 %v3126_v5, %v3894_v1 }
 0x33e   :  { %3704 = vrsqrt.f32 %v1054_v42  ;;  %3598 = vmatmul.mubr.f32.vlgmr.msra.gmra.mrb[4].mxu1 %v4103_v10 }
 0x33f   :  { %3601 = vmatpush3.msra.mxu1 %v4110_v12  ;;  %3602 = vmatprep.mubr.msk.f32.mxu1 %vm3823_vm0, %v3822_v3 }
 0x340   :  { %v3699_v46 = vpop.eup %3698 }
 0x341   :  { %v1066_v50 = vrot.slane %v3699_v46, %v4190_v45 }
 0x342   :  { %3568 = vmatmul.mubr.f32.vlgmr.msra.gmra.mrb[4].mxu0 %v4115_v18 }
 0x343   :  { %3571 = vmatpush3.msra.mxu0 %v4121_v19  ;;  %3572 = vmatprep.mubr.msk.f32.mxu0 %vm3823_vm0, %v3822_v3 }
 0x344   :  { %v3701_v0 = vpop.eup %3700 }
 0x345   :  { %v1057_v49 = vmul.f32 %v3701_v0, %v4028_v7  ;;  %v3703_v38 = vpop.eup %3702 }
 0x346   :  { %3603 = vmatmul.mubr.f32.vlgmr.msra.gmra.mrb[4].mxu1 %v4103_v10  ;;  %v1070_v55 = vrot.slane %v3703_v38, %v4190_v45  ;;  %v3828_v38 = vmov 842150450  }
 0x347   :  { %v1092_v51 = vmul.f32 %v1066_v50, %v1057_v49  ;;  %v3827_v49 = vmov 269488144  }
 0x348   :  { %v3705_v16 = vpop.eup %3704  ;;  %v3202_v50 = vunpack.c.l.s4 %v3827_v49 }
 0x349   :  { %v3033_v52 = vadd.f32 %v4025_v63, %v1092_v51  ;;  %v3055_v53 = vadd.f32 %v1092_v51, %v4043_v4  ;;  %v1058_v54 = vmul.f32 %v3705_v16, %v4018_v60  ;;  %v3209_v51 = vunpack.c.l.s4 %v3828_v38 }
 0x34a   :  { %3573 = vmatmul.mubr.f32.vlgmr.msra.gmra.mrb[4].mxu0 %v4115_v18  ;;  %v3829_v16 = vmov 1414812756  }
 0x34b   :  { %v3035_v3 = vsel %vm1106_vm2, %v3033_v52, -inf  ;;  %v3057_v7 = vsel %vm1106_vm2, %v3055_v53, -inf  ;;  %v1093_v56 = vmul.f32 %v1070_v55, %v1058_v54  ;;  %v3216_v52 = vunpack.c.l.s4 %v3829_v16 }
 0x34c   :  { %v3058_v44 = vrot.slane %v3057_v7, 4  ;;  %3036 = vmax.xlane.f32.xlu1 %v3035_v3  ;;  %v3830_v53 = vmov 1987475062  }
 0x34d   :  { %v3034_v57 = vadd.f32 %v4016_v58, %v1093_v56  ;;  %v3056_v59 = vadd.f32 %v1093_v56, %v4038_v24  ;;  %v3223_v54 = vunpack.c.l.s4 %v3830_v53  ;;  %v3203_v56 = vunpack.c.0.s8 %v3202_v50 }
 0x34e   :  { %v3059_v63 = vmax.f32 %v3057_v7, %v3058_v44 }
 0x34f   :  { %v3038_v4 = vsel %vm1106_vm2, %v3034_v57, -inf  ;;  %v3064_v60 = vsel %vm1106_vm2, %v3056_v59, -inf  ;;  %v3210_v59 = vunpack.c.0.s8 %v3209_v51 }
 0x350   :  { %v3060_v26 = vrot.slane %v3059_v63, 2  ;;  %v3065_v61 = vrot.slane %v3064_v60, 4  ;;  %3039 = vmax.xlane.f32.xlu0 %v3038_v4  ;;  %v3224_v4 = vunpack.c.0.s8 %v3223_v54 }
 0x352   :  { %v3061_v62 = vmax.f32 %v3059_v63, %v3060_v26  ;;  %v3066_v6 = vmax.f32 %v3064_v60, %v3065_v61  ;;  %v3217_v63 = vunpack.c.0.s8 %v3216_v52 }
 0x354   :  { %v3062_v8 = vrot.slane %v3061_v62, 1  ;;  %v3067_v9 = vrot.slane %v3066_v6, 2 }
 0x356   :  { %v3063_v10 = vmax.f32 %v3061_v62, %v3062_v8  ;;  %v3068_v11 = vmax.f32 %v3066_v6, %v3067_v9  ;;  %v3206_v62 = vsub.s32 %v3203_v56, %v3894_v1  ;;  %v3213_v9 = vsub.s32 %v3210_v59, %v3894_v1 }
 0x358   :  { %v3351_v12 = vmul.f32 -5.0, %v3063_v10  ;;  %v3069_v17 = vrot.slane %v3068_v11, 1  ;;  %v3220_v10 = vsub.s32 %v3217_v63, %v3894_v1 }
 0x35a   :  { %v3075_v18 = vmul.f32 1.442695, %v3351_v12  ;;  %v3070_v58 = vmax.f32 %v3068_v11, %v3069_v17 }
 0x35c   :  { %3706 = vpow2.f32 %v3075_v18  ;;  %v3352_v24 = vmul.f32 -5.0, %v3070_v58 }
 0x35e   :  { %v3077_v19 = vmul.f32 1.442695, %v3352_v24 }
 0x360   :  { %3708 = vpow2.f32 %v3077_v19 }
 0x366   :  { %v3707_v20 = vpop.eup %3706 }
 0x367   :  { %v3079_v21 = vadd.f32 1.0, %v3707_v20 }
 0x369   :  { %3710 = vrcp.f32 %v3079_v21 }
 0x36a   :  { %v3709_v27 = vpop.eup %3708 }
 0x36b   :  { %v3080_v28 = vadd.f32 1.0, %v3709_v27 }
 0x36d   :  { %3712 = vrcp.f32 %v3080_v28 }
 0x373   :  { %v3711_v47 = vpop.eup %3710 }
 0x374   :  { %v3181_v48 = vrot.slane %v3711_v47, %v4211_v30 }
 0x377   :  { %v3713_v31 = vpop.eup %3712 }
 0x378   :  { %v3188_v2 = vrot.slane %v3713_v31, %v4211_v30 }
 0x37a   :  { %v3191_v25 = vrot.slane %v3188_v2, 7 }
 0x37c   :  { %v3192_v32 = vsel %vm1071_vm3, %v3191_v25, %v3181_v48 }
 0x37d   :  { %v3193_v33 = vsel %vm1074_vm4, %v3191_v25, %v3192_v32 }
 0x37e   :  { %v3194_v34 = vsel %vm1078_vm5, %v3191_v25, %v3193_v33 }
 0x37f   :  { %v3195_v35 = vsel %vm1082_vm6, %v3191_v25, %v3194_v34 }
 0x380   :  { %3198 = vst.msk [vmem:[#allocation8 + $0x4] sm:$0x3] %vm3197_vm7, %v3195_v35 }
 0x3d9   :  { %v3037_v37 = vpop.xlane.xlu1 %3036 }
 0x3da   :  { %v3349_v39 = vmul.f32 -5.0, %v3037_v37 }
 0x3dc   :  { %v3045_v40 = vmul.f32 1.442695, %v3349_v39 }
 0x3dd   :  { %v3040_v41 = vpop.xlane.xlu0 %3039 }
 0x3de   :  { %3714 = vpow2.f32 %v3045_v40  ;;  %v3350_v42 = vmul.f32 -5.0, %v3040_v41 }
 0x3e0   :  { %v3047_v43 = vmul.f32 1.442695, %v3350_v42 }
 0x3e2   :  { %3716 = vpow2.f32 %v3047_v43 }
 0x3e8   :  { %v3715_v46 = vpop.eup %3714 }
 0x3e9   :  { %v3049_v0 = vadd.f32 1.0, %v3715_v46 }
 0x3eb   :  { %3718 = vrcp.f32 %v3049_v0 }
 0x3ec   :  { %v3717_v55 = vpop.eup %3716 }
 0x3ed   :  { %v3050_v3 = vadd.f32 1.0, %v3717_v55  ;;  %v2063_v7 = vpop.f32.mrb[2].mxu1 }
 0x3ee   :  { %v2068_v44 = vmul.f32 %v2063_v7, %v3927_v13  ;;  %v3544_v57 = vpop.f32.mrb[3].mxu1  ;;  %v3227_v13 = vsub.s32 %v3224_v4, %v3894_v1 }
 0x3ef   :  { %3720 = vrcp.f32 %v3050_v3 }
 0x3f0   :  { %v3092_v60 = vsel %vm128_vm1, %v2068_v44, -inf }
 0x3f1   :  { %v3093_v26 = vrot.slane %v3092_v60, 4  ;;  %v1614_v61 = vpop.f32.mrb[2].mxu0 }
 0x3f2   :  { %v2067_v6 = vmul.f32 %v1614_v61, %v3943_v22  ;;  %v3514_v8 = vpop.f32.mrb[3].mxu0 }
 0x3f3   :  { %v3094_v11 = vmax.f32 %v3092_v60, %v3093_v26 }
 0x3f4   :  { %v3085_v12 = vsel %vm128_vm1, %v2067_v6, -inf }
 0x3f5   :  { %v3719_v17 = vpop.eup %3718  ;;  %v3095_v18 = vrot.slane %v3094_v11, 2  ;;  %v3086_v58 = vrot.slane %v3085_v12, 4 }
 0x3f6   :  { %v3207_v24 = vrot.slane %v3719_v17, %v3206_v62  ;;  %v3214_v19 = vrot.slane %v3719_v17, %v3213_v9  ;;  %v3221_v20 = vrot.slane %v3719_v17, %v3220_v10  ;;  %v3228_v21 = vrot.slane %v3719_v17, %v3227_v13 }
 0x3f7   :  { %v3096_v27 = vmax.f32 %v3094_v11, %v3095_v18  ;;  %v3087_v28 = vmax.f32 %v3085_v12, %v3086_v58 }
 0x3f8   :  { %v3257_v22 = vcombine.low %v3207_v24, %v3214_v19  ;;  %v3258_v29 = vcombine.low %v3221_v20, %v3228_v21 }
 0x3f9   :  { %v3721_v15 = vpop.eup %3720  ;;  %v3097_v5 = vrot.slane %v3096_v27, 1  ;;  %v3088_v47 = vrot.slane %v3087_v28, 2 }
 0x3fa   :  { %v3265_v31 = vrot.slane %v3257_v22, %v4211_v30  ;;  %v3272_v1 = vrot.slane %v3258_v29, %v4211_v30  ;;  %v3235_v2 = vrot.slane %v3721_v15, %v3206_v62  ;;  %v3242_v25 = vrot.slane %v3721_v15, %v3213_v9 }
 0x3fb   :  { %v3098_v48 = vmax.f32 %v3096_v27, %v3097_v5  ;;  %v3089_v32 = vmax.f32 %v3087_v28, %v3088_v47  ;;  %v3249_v33 = vrot.slane %v3721_v15, %v3220_v10  ;;  %v3256_v34 = vrot.slane %v3721_v15, %v3227_v13 }
 0x3fc   :  { %v3273_v35 = vcombine.low %v3265_v31, %v3272_v1  ;;  %v3274_v36 = vcombine.low %v3235_v2, %v3242_v25 }
 0x3fd   :  { %v3137_v37 = vrot.slane %v3098_v48, %v4211_v30  ;;  %v3090_v39 = vrot.slane %v3089_v32, 1  ;;  %v3275_v40 = vcombine.low %v3249_v33, %v3256_v34 }
 0x3fe   :  { %3292 = vperm.xlu1 %3680, %v3273_v35   ;;  %v3282_v41 = vrot.slane %v3274_v36, %v4211_v30 }
 0x3ff   :  { %v3091_v42 = vmax.f32 %v3089_v32, %v3090_v39  ;;  %v3289_v43 = vrot.slane %v3275_v40, %v4211_v30  ;;  %v3140_v46 = vrot.slane %v3137_v37, 7 }
 0x401   :  { %v3130_v0 = vrot.slane %v3091_v42, %v4211_v30  ;;  %v3290_v49 = vcombine.low %v3282_v41, %v3289_v43 }
 0x403   :  { %3295 = vperm.xlu0 %3681, %v3290_v49   ;;  %v3141_v50 = vsel %vm1071_vm3, %v3140_v46, %v3130_v0 }
 0x404   :  { %v3142_v38 = vsel %vm1074_vm4, %v3140_v46, %v3141_v50 }
 0x405   :  { %v3143_v51 = vsel %vm1078_vm5, %v3140_v46, %v3142_v38 }
 0x406   :  { %v3144_v16 = vsel %vm1082_vm6, %v3140_v46, %v3143_v51 }
 0x407   :  { %3147 = vst.msk [vmem:[#allocation8] sm:$0x3] %vm3146_vm8, %v3144_v16 }
 0x408   :  { %3777 = shalt.err (!%p3774_p6)
}
 0x409   :  { %s3778_s24 = scalar_lea.hbm %s4286_s4, 768 }
 0x40a   :  { %p3779_p7 = scmp.ne.s32.totalorder %s4286_s4, %s3778_s24  ;;  %p3782_p8 = scmp.lt.u32.totalorder %s3778_s24, %s4286_s4 }
 0x40c   :  { %p3784_p9 = pnand %p3782_p8, %p3779_p7 }
 0x40e   :  { %3787 = shalt.err (!%p3784_p9)
}
 0x40f   :  { %3326 = dma.vmem_to_hbm [thread:$0]  %s3321_s3, 768, %s4286_s4, [#allocation4], %s3819_s28, %s3819_s28, %s3820_s29  }
 0x410   :  { %s3832_s4 = smov [#allocation8]  }
 0x411   :  { %s3333_s28 = sshll.u32 %s3832_s4, 4  ;;  %s3334_s28 = int_to_ptr.vmem [resolvable:$true] %s3333_s28 }
 0x412   :  { %s3788_s29 = scalar_lea.vmem %s3334_s28, 128  ;;  %p3793_p11 = scmp.lt.s32.totalorder %s3334_s28, %s3334_s28 }
 0x413   :  { %p3789_p10 = scmp.ne.s32.totalorder %s3334_s28, %s3788_s29  ;;  %p3794_p12 = scmp.lt.s32.totalorder %s3788_s29, %s3788_s29 }
 0x415   :  { %p3795_p13 = por %p3794_p12, %p3793_p11 }
 0x417   :  { %p3796_p0 = pnand %p3795_p13, %p3789_p10 }
 0x419   :  { %v3027_v52 = vpop.f32.mrb[4].mxu1 }
 0x41a   :  { %v3032_v53 = vmul.f32 %v3027_v52, %v3929_v14  ;;  %v3604_v54 = vpop.f32.mrb[5].mxu1 }
 0x41c   :  { %v3106_v55 = vsel %vm128_vm1, %v3032_v53, -inf }
 0x41d   :  { %v3107_v3 = vrot.slane %v3106_v55, 4  ;;  %v2546_v7 = vpop.f32.mrb[4].mxu0 }
 0x41e   :  { %v3031_v56 = vmul.f32 %v2546_v7, %v3945_v23  ;;  %v3574_v44 = vpop.f32.mrb[5].mxu0 }
 0x41f   :  { %v3108_v57 = vmax.f32 %v3106_v55, %v3107_v3 }
 0x420   :  { %v3099_v59 = vsel %vm128_vm1, %v3031_v56, -inf }
 0x421   :  { %v3109_v63 = vrot.slane %v3108_v57, 2  ;;  %v3100_v4 = vrot.slane %v3099_v59, 4 }
 0x423   :  { %v3110_v60 = vmax.f32 %v3108_v57, %v3109_v63  ;;  %v3101_v26 = vmax.f32 %v3099_v59, %v3100_v4 }
 0x425   :  { %v3111_v61 = vrot.slane %v3110_v60, 1  ;;  %v3102_v62 = vrot.slane %v3101_v26, 2 }
 0x427   :  { %v3112_v6 = vmax.f32 %v3110_v60, %v3111_v61  ;;  %v3103_v8 = vmax.f32 %v3101_v26, %v3102_v62 }
 0x429   :  { %v3163_v14 = vrot.slane %v3112_v6, %v4211_v30  ;;  %v3104_v9 = vrot.slane %v3103_v8, 1 }
 0x42b   :  { %v3105_v10 = vmax.f32 %v3103_v8, %v3104_v9  ;;  %v3166_v13 = vrot.slane %v3163_v14, 7 }
 0x42d   :  { %v3156_v11 = vrot.slane %v3105_v10, %v4211_v30 }
 0x42f   :  { %v3167_v23 = vsel %vm1071_vm3, %v3166_v13, %v3156_v11 }
 0x430   :  { %v3168_v12 = vsel %vm1074_vm4, %v3166_v13, %v3167_v23 }
 0x431   :  { %v3169_v17 = vsel %vm1078_vm5, %v3166_v13, %v3168_v12 }
 0x432   :  { %v3170_v18 = vsel %vm1082_vm6, %v3166_v13, %v3169_v17 }
 0x433   :  { %3172 = vst.msk [vmem:[#allocation8 + $0x2] sm:$0x3] %vm3146_vm8, %v3170_v18 }
 0x47d   :  { %v3293_v58 = vpop.permute.xlu1 %3292 }
 0x47e   :  { %v3300_v19 = vrot.slane %v3293_v58, %v4190_v45 }
 0x482   :  { %v3296_v24 = vpop.permute.xlu0 %3295 }
 0x483   :  { %v3304_v20 = vrot.slane %v3296_v24, %v4190_v45 }
 0x485   :  { %v3305_v21 = vsel %vm1071_vm3, %v3304_v20, %v3300_v19 }
 0x486   :  { %v3312_v27 = vrot.slane %v3305_v21, %v4211_v30 }
 0x488   :  { %3314 = vst.msk [vmem:[#allocation8 + $0x6] sm:$0x3] %vm3197_vm7, %v3312_v27 }
 0x489   :  { %3799 = shalt.err (!%p3796_p0)
}
 0x48a   :  { %s3800_s10 = scalar_lea.hbm %s4287_s5, 128 }
 0x48b   :  { %p3801_p1 = scmp.ne.s32.totalorder %s4287_s5, %s3800_s10  ;;  %p3804_p2 = scmp.lt.u32.totalorder %s3800_s10, %s4287_s5 }
 0x48d   :  { %p3806_p3 = pnand %p3804_p2, %p3801_p1 }
 0x48f   :  { %3809 = shalt.err (!%p3806_p3)
}
 0x490   :  { %3336 = dma.vmem_to_hbm [thread:$0]  %s3334_s28, 128, %s4287_s5, [#allocation9]  }
 0x491   :  { %3814 = dma.done.wait [#allocation4], 768  }
 0x492   :  { %3815 = vsyncadd [#allocation4], 4294966528 }
 0x493   :  { %3816 = dma.done.wait [#allocation9], 128  }
 0x494   :  { %3817 = vsyncadd [#allocation9], 4294967168 }
 0x495   :  { %3343 = vsyncpa [#allocation3], 1 }
 0x496   :  { %3344 = vsyncpa [#allocation6], 1 }
 0x497   :  { %3345 = vsyncpa [#allocation4], 1 }
 0x498   :  { %3346 = vsyncpa [#allocation9], 1 }

</bundles_post_ra>
